<compile_context>
chip_gen: v6e
topology: v6e:2x2x1
jax: 0.10.0
libtpu: 0.0.40
codegen_flags: <defaults>
</compile_context>

<pallas_src>
import functools

import jax
import jax.numpy as jnp
from jax.experimental import pallas as pl
from jax.experimental.pallas import tpu as pltpu


def _round_up(a, b):
    return ((a + b - 1) // b) * b


def _weighted_loss_kernel(x_ref, lab_ref, sum_ref, cnt_ref, *, num_classes,
                          tile_rows):
    """One grid step: a (C, TR, 128) slab of logits + (TR, 128) labels.

    x_ref   : (1, C, TR, 128)   logits (native dtype, cast to f32 here)
    lab_ref : (1, TR, 128)      int32 labels (-1 == padded pixel)
    sum_ref : (1, 1, C, 8, 128) per-class partial sums of logp at the label
    cnt_ref : (1, 1, C, 8, 128) per-class partial pixel counts
    """
    j = pl.program_id(2)

    @pl.when(j == 0)
    def _():
        sum_ref[...] = jnp.zeros_like(sum_ref)
        cnt_ref[...] = jnp.zeros_like(cnt_ref)

    x = x_ref[0].astype(jnp.float32)                     # (C, TR, 128)
    lab = lab_ref[0]                                     # (TR, 128) int32

    # Channel log-softmax: reductions over the leading C axis are elementwise
    # combines of fully packed (TR, 128) vregs (VPU), exps go to the EUP.
    m = jnp.max(x, axis=0)                               # (TR, 128)
    xm = x - m[None, :, :]
    s = jnp.sum(jnp.exp(xm), axis=0)                     # (TR, 128)
    logs = jnp.log(s)                                    # (TR, 128)

    g = tile_rows // 8
    for c in range(num_classes):                         # static unroll (C small)
        mask = lab == c                                  # padded pixels never match
        sel = jnp.where(mask, xm[c] - logs, 0.0)         # (TR, 128)
        ones = mask.astype(jnp.float32)
        # Fold the tile to one (8, 128) vreg (sublane-aligned reshape, pure VPU
        # adds) and accumulate into the resident output block.
        sum_ref[0, 0, c] += sel.reshape(g, 8, 128).sum(axis=0)
        cnt_ref[0, 0, c] += ones.reshape(g, 8, 128).sum(axis=0)


@functools.partial(jax.jit, static_argnames=("tile_rows",))
def weighted_loss(x, labels, *, tile_rows=1024):
    """x: (N, C, H, W) logits (f32 or bf16). labels: (N, H, W) integer class map.

    Equivalent to WeightedLoss()(x, one_hot(labels)) of the PyTorch module.
    Returns a scalar float32 loss.
    """
    N, C, H, W = x.shape
    assert labels.shape == (N, H, W), (labels.shape, (N, H, W))
    HW = H * W
    P = N * HW                                   # denominator of mean(dim=(0,2,3))

    LANES = 128
    tile_rows = max(8, (tile_rows // 8) * 8)     # sublane multiple
    R0 = pl.cdiv(HW, LANES)                      # rows of 128 pixels (ceil)
    TR = min(tile_rows, _round_up(R0, 8))        # rows per grid step (mult of 8)
    R_pad = _round_up(R0, TR)
    n_tiles = R_pad // TR

    # v7x: when the batch axis cannot feed both TensorCores, split the pixel-tile
    # axis into a 2-way parallel outer grid dim (only when it divides evenly).
    n_splits = 2 if (N == 1 and n_tiles % 2 == 0 and n_tiles >= 2) else 1
    tiles_per_split = n_tiles // n_splits

    # Layout: pixels -> (rows, 128) lane-dense tiles; class axis stays leading.
    # Padded pixels: logits 0 (finite log-softmax), label -1 (matches no class).
    pad_pix = R_pad * LANES - HW
    xf = x.reshape(N, C, HW)                     # native dtype, no upcast here
    lf = labels.reshape(N, HW).astype(jnp.int32)
    if pad_pix:
        xf = jnp.pad(xf, ((0, 0), (0, 0), (0, pad_pix)))
        lf = jnp.pad(lf, ((0, 0), (0, pad_pix)), constant_values=-1)
    xf = xf.reshape(N, C, R_pad, LANES)
    lf = lf.reshape(N, R_pad, LANES)

    kernel = functools.partial(_weighted_loss_kernel, num_classes=C,
                               tile_rows=TR)

    cost = pl.CostEstimate(
        flops=10 * C * N * R_pad * LANES,
        transcendentals=(C + 1) * N * R_pad * LANES,
        bytes_accessed=(xf.size * xf.dtype.itemsize + lf.size * 4
                        + 2 * N * n_splits * C * 8 * LANES * 4),
    )

    sums, cnts = pl.pallas_call(
        kernel,
        out_shape=(jax.ShapeDtypeStruct((N, n_splits, C, 8, LANES), jnp.float32),
                   jax.ShapeDtypeStruct((N, n_splits, C, 8, LANES), jnp.float32)),
        grid_spec=pltpu.PrefetchScalarGridSpec(
            num_scalar_prefetch=0,
            grid=(N, n_splits, tiles_per_split),
            in_specs=[
                pl.BlockSpec((1, C, TR, LANES),
                             lambda n, s, j: (n, 0, s * tiles_per_split + j, 0)),
                pl.BlockSpec((1, TR, LANES),
                             lambda n, s, j: (n, s * tiles_per_split + j, 0)),
            ],
            out_specs=(
                pl.BlockSpec((1, 1, C, 8, LANES),
                             lambda n, s, j: (n, s, 0, 0, 0)),
                pl.BlockSpec((1, 1, C, 8, LANES),
                             lambda n, s, j: (n, s, 0, 0, 0)),
            ),
        ),
        compiler_params=pltpu.CompilerParams(
            dimension_semantics=("parallel", "parallel", "arbitrary"),
        ),
        cost_estimate=cost,
    )(xf, lf)

    per_class_sum = jnp.sum(sums, axis=(0, 1, 3, 4))     # (C,) Σ_pixels logp[label]
    counts = jnp.sum(cnts, axis=(0, 1, 3, 4))            # (C,) pixels per class

    # WeightMap (assumed): inverse class frequency, per-pixel weight = cw[label].
    # TODO(synk): verify clamp/normalization against the real WeightMap source.
    cw = counts.sum() / (C * jnp.maximum(counts, 1.0))

    # -mean(dim=(0,2,3)).sum() == -(1/P) * Σ_c cw_c * Σ_{label==c} logp_c
    return -jnp.sum(cw * per_class_sum) / float(P)


def weighted_loss_from_onehot(x, y, *, tile_rows=1024):
    """Convenience wrapper matching the PyTorch signature (y one-hot, NCHW)."""
    labels = jnp.argmax(y, axis=1).astype(jnp.int32)
    return weighted_loss(x, labels, tile_rows=tile_rows)


def _reference_loss(x, y):
    """Pure-JAX reference mirroring the PyTorch forward (y one-hot)."""
    C = x.shape[1]
    counts = y.sum(axis=(0, 2, 3))
    cw = counts.sum() / (C * jnp.maximum(counts, 1.0))
    w = (y * cw.reshape(1, C, 1, 1)).sum(axis=1, keepdims=True)
    logp = jax.nn.log_softmax(x, axis=1)
    t = w * (y * logp)
    return -(t.mean(axis=(0, 2, 3))).sum()


if __name__ == "__main__":
    key = jax.random.PRNGKey(0)
    k1, k2, k3, k4, k5, k6 = jax.random.split(key, 6)

    def onehot_nchw(lab, C):
        return jnp.transpose(jax.nn.one_hot(lab, C, dtype=jnp.float32),
                             (0, 3, 1, 2))

    # Case 1: lane-aligned spatial size, f32 logits, batch=2.
    N, C, H, W = 2, 4, 16, 16
    x = jax.random.normal(k1, (N, C, H, W), dtype=jnp.float32)
    labels = jax.random.randint(k2, (N, H, W), 0, C)
    loss = jax.block_until_ready(weighted_loss(x, labels))
    ref = jax.block_until_ready(_reference_loss(x, onehot_nchw(labels, C)))
    assert jnp.allclose(loss, ref, rtol=1e-5, atol=1e-5), (loss, ref)

    # Case 2: ragged H*W (400 pixels -> padded pixel axis), small tile.
    H2, W2 = 20, 20
    x2 = jax.random.normal(k3, (N, C, H2, W2), dtype=jnp.float32)
    labels2 = jax.random.randint(k4, (N, H2, W2), 0, C)
    loss2 = jax.block_until_ready(weighted_loss(x2, labels2, tile_rows=8))
    ref2 = jax.block_until_ready(_reference_loss(x2, onehot_nchw(labels2, C)))
    assert jnp.allclose(loss2, ref2, rtol=1e-5, atol=1e-5), (loss2, ref2)

    # Case 3: N=1 (2-way pixel split path) with bf16 logits streamed natively.
    N3, H3, W3 = 1, 64, 64
    x3 = jax.random.normal(k5, (N3, C, H3, W3), dtype=jnp.float32).astype(jnp.bfloat16)
    labels3 = jax.random.randint(k6, (N3, H3, W3), 0, C)
    loss3 = jax.block_until_ready(weighted_loss(x3, labels3, tile_rows=8))
    ref3 = jax.block_until_ready(
        _reference_loss(x3.astype(jnp.float32), onehot_nchw(labels3, C)))
    assert jnp.allclose(loss3, ref3, rtol=1e-5, atol=1e-5), (loss3, ref3)

    # One-hot convenience wrapper agrees with the label-map entry point.
    loss1b = jax.block_until_ready(weighted_loss_from_onehot(x, onehot_nchw(labels, C)))
    assert jnp.allclose(loss1b, loss, rtol=1e-6, atol=1e-6), (loss1b, loss)

    print("KERNEL_OK")
</pallas_src>

<mosaic_0001>
module attributes {stable_mosaic.version = 11 : i64} {
  func.func @_weighted_loss_kernel(%arg0: i32, %arg1: i32, %arg2: i32, %arg3: memref<1x4x8x128xf32, #tpu.memory_space<vmem>>, %arg4: memref<1x8x128xi32, #tpu.memory_space<vmem>>, %arg5: memref<1x1x4x8x128xf32, #tpu.memory_space<vmem>>, %arg6: memref<1x1x4x8x128xf32, #tpu.memory_space<vmem>>) attributes {dimension_semantics = [#tpu.dimension_semantics<parallel>, #tpu.dimension_semantics<parallel>, #tpu.dimension_semantics<arbitrary>], iteration_bounds = array<i64: 2, 1, 1>, scalar_prefetch = 0 : i64, scratch_operands = 0 : i64, tpu.core_type = #tpu.core_type<tc>, window_params = [{transform_indices = @transform_0, window_bounds = array<i64: 1, 4, 8, 128>}, {transform_indices = @transform_1, window_bounds = array<i64: 1, 8, 128>}, {transform_indices = @transform_2, window_bounds = array<i64: 1, 1, 4, 8, 128>}, {transform_indices = @transform_3, window_bounds = array<i64: 1, 1, 4, 8, 128>}]} {
    %c0_i32 = arith.constant 0 : i32
    %0 = arith.cmpi eq, %arg2, %c0_i32 : i32
    %1 = arith.extui %0 : i1 to i32
    %c0_i32_0 = arith.constant 0 : i32
    %2 = arith.cmpi ne, %1, %c0_i32_0 : i32
    scf.if %2 {
      %cst_98 = arith.constant 0.000000e+00 : f32
      %114 = vector.broadcast %cst_98 : f32 to vector<1x1x4x8x128xf32>
      %c0_99 = arith.constant 0 : index
      %c0_100 = arith.constant 0 : index
      %c0_101 = arith.constant 0 : index
      %c0_102 = arith.constant 0 : index
      %c0_103 = arith.constant 0 : index
      %115 = vector.load %arg5[%c0_99, %c0_100, %c0_101, %c0_102, %c0_103] : memref<1x1x4x8x128xf32, #tpu.memory_space<vmem>>, vector<1x1x4x8x128xf32>
      tpu.vector_store %arg5[%c0_99, %c0_100, %c0_101, %c0_102, %c0_103], %114 {strides = array<i32>} : memref<1x1x4x8x128xf32, #tpu.memory_space<vmem>>, vector<1x1x4x8x128xf32>,
      %cst_104 = arith.constant 0.000000e+00 : f32
      %116 = vector.broadcast %cst_104 : f32 to vector<1x1x4x8x128xf32>
      %c0_105 = arith.constant 0 : index
      %c0_106 = arith.constant 0 : index
      %c0_107 = arith.constant 0 : index
      %c0_108 = arith.constant 0 : index
      %c0_109 = arith.constant 0 : index
      %117 = vector.load %arg6[%c0_105, %c0_106, %c0_107, %c0_108, %c0_109] : memref<1x1x4x8x128xf32, #tpu.memory_space<vmem>>, vector<1x1x4x8x128xf32>
      tpu.vector_store %arg6[%c0_105, %c0_106, %c0_107, %c0_108, %c0_109], %116 {strides = array<i32>} : memref<1x1x4x8x128xf32, #tpu.memory_space<vmem>>, vector<1x1x4x8x128xf32>,
    } else {
    }
    %c0 = arith.constant 0 : index
    %c0_1 = arith.constant 0 : index
    %c0_2 = arith.constant 0 : index
    %c0_3 = arith.constant 0 : index
    %3 = vector.load %arg3[%c0, %c0_1, %c0_2, %c0_3] : memref<1x4x8x128xf32, #tpu.memory_space<vmem>>, vector<1x4x8x128xf32>
    %4 = vector.shape_cast %3 : vector<1x4x8x128xf32> to vector<4x8x128xf32>
    %c0_4 = arith.constant 0 : index
    %c0_5 = arith.constant 0 : index
    %c0_6 = arith.constant 0 : index
    %5 = vector.load %arg4[%c0_4, %c0_5, %c0_6] : memref<1x8x128xi32, #tpu.memory_space<vmem>>, vector<1x8x128xi32>
    %6 = vector.shape_cast %5 : vector<1x8x128xi32> to vector<8x128xi32>
    %cst = arith.constant dense<0xFF800000> : vector<8x128xf32>
    %7 = vector.multi_reduction <maximumf>, %4, %cst [0] : vector<4x8x128xf32> to vector<8x128xf32>
    %8 = vector.shape_cast %7 : vector<8x128xf32> to vector<1x8x128xf32>
    %9 = vector.broadcast %8 : vector<1x8x128xf32> to vector<4x8x128xf32>
    %10 = arith.subf %4, %9 : vector<4x8x128xf32>
    %11 = math.exp %10 : vector<4x8x128xf32>
    %cst_7 = arith.constant dense<0.000000e+00> : vector<8x128xf32>
    %12 = vector.multi_reduction <add>, %11, %cst_7 [0] : vector<4x8x128xf32> to vector<8x128xf32>
    %13 = math.log %12 : vector<8x128xf32>
    %c0_i32_8 = arith.constant 0 : i32
    %14 = vector.broadcast %c0_i32_8 : i32 to vector<8x128xi32>
    %15 = arith.cmpi eq, %6, %14 : vector<8x128xi32>
    %16 = vector.extract_strided_slice %10 {offsets = [0, 0, 0], sizes = [1, 8, 128], strides = [1, 1, 1]} : vector<4x8x128xf32> to vector<1x8x128xf32>
    %17 = vector.shape_cast %16 : vector<1x8x128xf32> to vector<8x128xf32>
    %18 = arith.subf %17, %13 : vector<8x128xf32>
    %cst_9 = arith.constant 0.000000e+00 : f32
    %19 = vector.broadcast %cst_9 : f32 to vector<8x128xf32>
    %20 = arith.select %15, %18, %19 : vector<8x128xi1>, vector<8x128xf32>
    %21 = arith.extui %15 : vector<8x128xi1> to vector<8x128xi32>
    %22 = arith.sitofp %21 : vector<8x128xi32> to vector<8x128xf32>
    %c0_10 = arith.constant 0 : index
    %c0_11 = arith.constant 0 : index
    %c0_12 = arith.constant 0 : index
    %c0_13 = arith.constant 0 : index
    %c0_14 = arith.constant 0 : index
    %23 = vector.load %arg5[%c0_10, %c0_11, %c0_12, %c0_13, %c0_14] : memref<1x1x4x8x128xf32, #tpu.memory_space<vmem>>, vector<1x1x1x8x128xf32>
    %24 = vector.shape_cast %23 : vector<1x1x1x8x128xf32> to vector<8x128xf32>
    %25 = vector.shape_cast %20 : vector<8x128xf32> to vector<1x8x128xf32>
    %cst_15 = arith.constant dense<0.000000e+00> : vector<8x128xf32>
    %26 = vector.multi_reduction <add>, %25, %cst_15 [0] : vector<1x8x128xf32> to vector<8x128xf32>
    %27 = arith.addf %24, %26 : vector<8x128xf32>
    %c0_16 = arith.constant 0 : index
    %c0_17 = arith.constant 0 : index
    %c0_18 = arith.constant 0 : index
    %c0_19 = arith.constant 0 : index
    %c0_20 = arith.constant 0 : index
    %28 = vector.load %arg5[%c0_16, %c0_17, %c0_18, %c0_19, %c0_20] : memref<1x1x4x8x128xf32, #tpu.memory_space<vmem>>, vector<1x1x1x8x128xf32>
    %29 = vector.shape_cast %28 : vector<1x1x1x8x128xf32> to vector<8x128xf32>
    %30 = vector.shape_cast %27 : vector<8x128xf32> to vector<1x1x1x8x128xf32>
    tpu.vector_store %arg5[%c0_16, %c0_17, %c0_18, %c0_19, %c0_20], %30 {strides = array<i32>} : memref<1x1x4x8x128xf32, #tpu.memory_space<vmem>>, vector<1x1x1x8x128xf32>,
    %c0_21 = arith.constant 0 : index
    %c0_22 = arith.constant 0 : index
    %c0_23 = arith.constant 0 : index
    %c0_24 = arith.constant 0 : index
    %c0_25 = arith.constant 0 : index
    %31 = vector.load %arg6[%c0_21, %c0_22, %c0_23, %c0_24, %c0_25] : memref<1x1x4x8x128xf32, #tpu.memory_space<vmem>>, vector<1x1x1x8x128xf32>
    %32 = vector.shape_cast %31 : vector<1x1x1x8x128xf32> to vector<8x128xf32>
    %33 = vector.shape_cast %22 : vector<8x128xf32> to vector<1x8x128xf32>
    %cst_26 = arith.constant dense<0.000000e+00> : vector<8x128xf32>
    %34 = vector.multi_reduction <add>, %33, %cst_26 [0] : vector<1x8x128xf32> to vector<8x128xf32>
    %35 = arith.addf %32, %34 : vector<8x128xf32>
    %c0_27 = arith.constant 0 : index
    %c0_28 = arith.constant 0 : index
    %c0_29 = arith.constant 0 : index
    %c0_30 = arith.constant 0 : index
    %c0_31 = arith.constant 0 : index
    %36 = vector.load %arg6[%c0_27, %c0_28, %c0_29, %c0_30, %c0_31] : memref<1x1x4x8x128xf32, #tpu.memory_space<vmem>>, vector<1x1x1x8x128xf32>
    %37 = vector.shape_cast %36 : vector<1x1x1x8x128xf32> to vector<8x128xf32>
    %38 = vector.shape_cast %35 : vector<8x128xf32> to vector<1x1x1x8x128xf32>
    tpu.vector_store %arg6[%c0_27, %c0_28, %c0_29, %c0_30, %c0_31], %38 {strides = array<i32>} : memref<1x1x4x8x128xf32, #tpu.memory_space<vmem>>, vector<1x1x1x8x128xf32>,
    %c1_i32 = arith.constant 1 : i32
    %39 = vector.broadcast %c1_i32 : i32 to vector<8x128xi32>
    %40 = arith.cmpi eq, %6, %39 : vector<8x128xi32>
    %41 = vector.extract_strided_slice %10 {offsets = [1, 0, 0], sizes = [1, 8, 128], strides = [1, 1, 1]} : vector<4x8x128xf32> to vector<1x8x128xf32>
    %42 = vector.shape_cast %41 : vector<1x8x128xf32> to vector<8x128xf32>
    %43 = arith.subf %42, %13 : vector<8x128xf32>
    %cst_32 = arith.constant 0.000000e+00 : f32
    %44 = vector.broadcast %cst_32 : f32 to vector<8x128xf32>
    %45 = arith.select %40, %43, %44 : vector<8x128xi1>, vector<8x128xf32>
    %46 = arith.extui %40 : vector<8x128xi1> to vector<8x128xi32>
    %47 = arith.sitofp %46 : vector<8x128xi32> to vector<8x128xf32>
    %c0_33 = arith.constant 0 : index
    %c0_34 = arith.constant 0 : index
    %c1 = arith.constant 1 : index
    %c0_35 = arith.constant 0 : index
    %c0_36 = arith.constant 0 : index
    %48 = vector.load %arg5[%c0_33, %c0_34, %c1, %c0_35, %c0_36] : memref<1x1x4x8x128xf32, #tpu.memory_space<vmem>>, vector<1x1x1x8x128xf32>
    %49 = vector.shape_cast %48 : vector<1x1x1x8x128xf32> to vector<8x128xf32>
    %50 = vector.shape_cast %45 : vector<8x128xf32> to vector<1x8x128xf32>
    %cst_37 = arith.constant dense<0.000000e+00> : vector<8x128xf32>
    %51 = vector.multi_reduction <add>, %50, %cst_37 [0] : vector<1x8x128xf32> to vector<8x128xf32>
    %52 = arith.addf %49, %51 : vector<8x128xf32>
    %c0_38 = arith.constant 0 : index
    %c0_39 = arith.constant 0 : index
    %c1_40 = arith.constant 1 : index
    %c0_41 = arith.constant 0 : index
    %c0_42 = arith.constant 0 : index
    %53 = vector.load %arg5[%c0_38, %c0_39, %c1_40, %c0_41, %c0_42] : memref<1x1x4x8x128xf32, #tpu.memory_space<vmem>>, vector<1x1x1x8x128xf32>
    %54 = vector.shape_cast %53 : vector<1x1x1x8x128xf32> to vector<8x128xf32>
    %55 = vector.shape_cast %52 : vector<8x128xf32> to vector<1x1x1x8x128xf32>
    tpu.vector_store %arg5[%c0_38, %c0_39, %c1_40, %c0_41, %c0_42], %55 {strides = array<i32>} : memref<1x1x4x8x128xf32, #tpu.memory_space<vmem>>, vector<1x1x1x8x128xf32>,
    %c0_43 = arith.constant 0 : index
    %c0_44 = arith.constant 0 : index
    %c1_45 = arith.constant 1 : index
    %c0_46 = arith.constant 0 : index
    %c0_47 = arith.constant 0 : index
    %56 = vector.load %arg6[%c0_43, %c0_44, %c1_45, %c0_46, %c0_47] : memref<1x1x4x8x128xf32, #tpu.memory_space<vmem>>, vector<1x1x1x8x128xf32>
    %57 = vector.shape_cast %56 : vector<1x1x1x8x128xf32> to vector<8x128xf32>
    %58 = vector.shape_cast %47 : vector<8x128xf32> to vector<1x8x128xf32>
    %cst_48 = arith.constant dense<0.000000e+00> : vector<8x128xf32>
    %59 = vector.multi_reduction <add>, %58, %cst_48 [0] : vector<1x8x128xf32> to vector<8x128xf32>
    %60 = arith.addf %57, %59 : vector<8x128xf32>
    %c0_49 = arith.constant 0 : index
    %c0_50 = arith.constant 0 : index
    %c1_51 = arith.constant 1 : index
    %c0_52 = arith.constant 0 : index
    %c0_53 = arith.constant 0 : index
    %61 = vector.load %arg6[%c0_49, %c0_50, %c1_51, %c0_52, %c0_53] : memref<1x1x4x8x128xf32, #tpu.memory_space<vmem>>, vector<1x1x1x8x128xf32>
    %62 = vector.shape_cast %61 : vector<1x1x1x8x128xf32> to vector<8x128xf32>
    %63 = vector.shape_cast %60 : vector<8x128xf32> to vector<1x1x1x8x128xf32>
    tpu.vector_store %arg6[%c0_49, %c0_50, %c1_51, %c0_52, %c0_53], %63 {strides = array<i32>} : memref<1x1x4x8x128xf32, #tpu.memory_space<vmem>>, vector<1x1x1x8x128xf32>,
    %c2_i32 = arith.constant 2 : i32
    %64 = vector.broadcast %c2_i32 : i32 to vector<8x128xi32>
    %65 = arith.cmpi eq, %6, %64 : vector<8x128xi32>
    %66 = vector.extract_strided_slice %10 {offsets = [2, 0, 0], sizes = [1, 8, 128], strides = [1, 1, 1]} : vector<4x8x128xf32> to vector<1x8x128xf32>
    %67 = vector.shape_cast %66 : vector<1x8x128xf32> to vector<8x128xf32>
    %68 = arith.subf %67, %13 : vector<8x128xf32>
    %cst_54 = arith.constant 0.000000e+00 : f32
    %69 = vector.broadcast %cst_54 : f32 to vector<8x128xf32>
    %70 = arith.select %65, %68, %69 : vector<8x128xi1>, vector<8x128xf32>
    %71 = arith.extui %65 : vector<8x128xi1> to vector<8x128xi32>
    %72 = arith.sitofp %71 : vector<8x128xi32> to vector<8x128xf32>
    %c0_55 = arith.constant 0 : index
    %c0_56 = arith.constant 0 : index
    %c2 = arith.constant 2 : index
    %c0_57 = arith.constant 0 : index
    %c0_58 = arith.constant 0 : index
    %73 = vector.load %arg5[%c0_55, %c0_56, %c2, %c0_57, %c0_58] : memref<1x1x4x8x128xf32, #tpu.memory_space<vmem>>, vector<1x1x1x8x128xf32>
    %74 = vector.shape_cast %73 : vector<1x1x1x8x128xf32> to vector<8x128xf32>
    %75 = vector.shape_cast %70 : vector<8x128xf32> to vector<1x8x128xf32>
    %cst_59 = arith.constant dense<0.000000e+00> : vector<8x128xf32>
    %76 = vector.multi_reduction <add>, %75, %cst_59 [0] : vector<1x8x128xf32> to vector<8x128xf32>
    %77 = arith.addf %74, %76 : vector<8x128xf32>
    %c0_60 = arith.constant 0 : index
    %c0_61 = arith.constant 0 : index
    %c2_62 = arith.constant 2 : index
    %c0_63 = arith.constant 0 : index
    %c0_64 = arith.constant 0 : index
    %78 = vector.load %arg5[%c0_60, %c0_61, %c2_62, %c0_63, %c0_64] : memref<1x1x4x8x128xf32, #tpu.memory_space<vmem>>, vector<1x1x1x8x128xf32>
    %79 = vector.shape_cast %78 : vector<1x1x1x8x128xf32> to vector<8x128xf32>
    %80 = vector.shape_cast %77 : vector<8x128xf32> to vector<1x1x1x8x128xf32>
    tpu.vector_store %arg5[%c0_60, %c0_61, %c2_62, %c0_63, %c0_64], %80 {strides = array<i32>} : memref<1x1x4x8x128xf32, #tpu.memory_space<vmem>>, vector<1x1x1x8x128xf32>,
    %c0_65 = arith.constant 0 : index
    %c0_66 = arith.constant 0 : index
    %c2_67 = arith.constant 2 : index
    %c0_68 = arith.constant 0 : index
    %c0_69 = arith.constant 0 : index
    %81 = vector.load %arg6[%c0_65, %c0_66, %c2_67, %c0_68, %c0_69] : memref<1x1x4x8x128xf32, #tpu.memory_space<vmem>>, vector<1x1x1x8x128xf32>
    %82 = vector.shape_cast %81 : vector<1x1x1x8x128xf32> to vector<8x128xf32>
    %83 = vector.shape_cast %72 : vector<8x128xf32> to vector<1x8x128xf32>
    %cst_70 = arith.constant dense<0.000000e+00> : vector<8x128xf32>
    %84 = vector.multi_reduction <add>, %83, %cst_70 [0] : vector<1x8x128xf32> to vector<8x128xf32>
    %85 = arith.addf %82, %84 : vector<8x128xf32>
    %c0_71 = arith.constant 0 : index
    %c0_72 = arith.constant 0 : index
    %c2_73 = arith.constant 2 : index
    %c0_74 = arith.constant 0 : index
    %c0_75 = arith.constant 0 : index
    %86 = vector.load %arg6[%c0_71, %c0_72, %c2_73, %c0_74, %c0_75] : memref<1x1x4x8x128xf32, #tpu.memory_space<vmem>>, vector<1x1x1x8x128xf32>
    %87 = vector.shape_cast %86 : vector<1x1x1x8x128xf32> to vector<8x128xf32>
    %88 = vector.shape_cast %85 : vector<8x128xf32> to vector<1x1x1x8x128xf32>
    tpu.vector_store %arg6[%c0_71, %c0_72, %c2_73, %c0_74, %c0_75], %88 {strides = array<i32>} : memref<1x1x4x8x128xf32, #tpu.memory_space<vmem>>, vector<1x1x1x8x128xf32>,
    %c3_i32 = arith.constant 3 : i32
    %89 = vector.broadcast %c3_i32 : i32 to vector<8x128xi32>
    %90 = arith.cmpi eq, %6, %89 : vector<8x128xi32>
    %91 = vector.extract_strided_slice %10 {offsets = [3, 0, 0], sizes = [1, 8, 128], strides = [1, 1, 1]} : vector<4x8x128xf32> to vector<1x8x128xf32>
    %92 = vector.shape_cast %91 : vector<1x8x128xf32> to vector<8x128xf32>
    %93 = arith.subf %92, %13 : vector<8x128xf32>
    %cst_76 = arith.constant 0.000000e+00 : f32
    %94 = vector.broadcast %cst_76 : f32 to vector<8x128xf32>
    %95 = arith.select %90, %93, %94 : vector<8x128xi1>, vector<8x128xf32>
    %96 = arith.extui %90 : vector<8x128xi1> to vector<8x128xi32>
    %97 = arith.sitofp %96 : vector<8x128xi32> to vector<8x128xf32>
    %c0_77 = arith.constant 0 : index
    %c0_78 = arith.constant 0 : index
    %c3 = arith.constant 3 : index
    %c0_79 = arith.constant 0 : index
    %c0_80 = arith.constant 0 : index
    %98 = vector.load %arg5[%c0_77, %c0_78, %c3, %c0_79, %c0_80] : memref<1x1x4x8x128xf32, #tpu.memory_space<vmem>>, vector<1x1x1x8x128xf32>
    %99 = vector.shape_cast %98 : vector<1x1x1x8x128xf32> to vector<8x128xf32>
    %100 = vector.shape_cast %95 : vector<8x128xf32> to vector<1x8x128xf32>
    %cst_81 = arith.constant dense<0.000000e+00> : vector<8x128xf32>
    %101 = vector.multi_reduction <add>, %100, %cst_81 [0] : vector<1x8x128xf32> to vector<8x128xf32>
    %102 = arith.addf %99, %101 : vector<8x128xf32>
    %c0_82 = arith.constant 0 : index
    %c0_83 = arith.constant 0 : index
    %c3_84 = arith.constant 3 : index
    %c0_85 = arith.constant 0 : index
    %c0_86 = arith.constant 0 : index
    %103 = vector.load %arg5[%c0_82, %c0_83, %c3_84, %c0_85, %c0_86] : memref<1x1x4x8x128xf32, #tpu.memory_space<vmem>>, vector<1x1x1x8x128xf32>
    %104 = vector.shape_cast %103 : vector<1x1x1x8x128xf32> to vector<8x128xf32>
    %105 = vector.shape_cast %102 : vector<8x128xf32> to vector<1x1x1x8x128xf32>
    tpu.vector_store %arg5[%c0_82, %c0_83, %c3_84, %c0_85, %c0_86], %105 {strides = array<i32>} : memref<1x1x4x8x128xf32, #tpu.memory_space<vmem>>, vector<1x1x1x8x128xf32>,
    %c0_87 = arith.constant 0 : index
    %c0_88 = arith.constant 0 : index
    %c3_89 = arith.constant 3 : index
    %c0_90 = arith.constant 0 : index
    %c0_91 = arith.constant 0 : index
    %106 = vector.load %arg6[%c0_87, %c0_88, %c3_89, %c0_90, %c0_91] : memref<1x1x4x8x128xf32, #tpu.memory_space<vmem>>, vector<1x1x1x8x128xf32>
    %107 = vector.shape_cast %106 : vector<1x1x1x8x128xf32> to vector<8x128xf32>
    %108 = vector.shape_cast %97 : vector<8x128xf32> to vector<1x8x128xf32>
    %cst_92 = arith.constant dense<0.000000e+00> : vector<8x128xf32>
    %109 = vector.multi_reduction <add>, %108, %cst_92 [0] : vector<1x8x128xf32> to vector<8x128xf32>
    %110 = arith.addf %107, %109 : vector<8x128xf32>
    %c0_93 = arith.constant 0 : index
    %c0_94 = arith.constant 0 : index
    %c3_95 = arith.constant 3 : index
    %c0_96 = arith.constant 0 : index
    %c0_97 = arith.constant 0 : index
    %111 = vector.load %arg6[%c0_93, %c0_94, %c3_95, %c0_96, %c0_97] : memref<1x1x4x8x128xf32, #tpu.memory_space<vmem>>, vector<1x1x1x8x128xf32>
    %112 = vector.shape_cast %111 : vector<1x1x1x8x128xf32> to vector<8x128xf32>
    %113 = vector.shape_cast %110 : vector<8x128xf32> to vector<1x1x1x8x128xf32>
    tpu.vector_store %arg6[%c0_93, %c0_94, %c3_95, %c0_96, %c0_97], %113 {strides = array<i32>} : memref<1x1x4x8x128xf32, #tpu.memory_space<vmem>>, vector<1x1x1x8x128xf32>,
    return
  }
  func.func @transform_0(%arg0: i32, %arg1: i32, %arg2: i32) -> (i32, i32, i32, i32) {
    %c1_i32 = arith.constant 1 : i32
    %0 = arith.muli %arg1, %c1_i32 : i32
    %1 = arith.addi %0, %arg2 : i32
    %c0_i32 = arith.constant 0 : i32
    %c0_i32_0 = arith.constant 0 : i32
    %c0_i32_1 = arith.constant 0 : i32
    return %arg0, %c0_i32, %1, %c0_i32_0 : i32, i32, i32, i32
  }
  func.func @transform_1(%arg0: i32, %arg1: i32, %arg2: i32) -> (i32, i32, i32) {
    %c1_i32 = arith.constant 1 : i32
    %0 = arith.muli %arg1, %c1_i32 : i32
    %1 = arith.addi %0, %arg2 : i32
    %c0_i32 = arith.constant 0 : i32
    %c0_i32_0 = arith.constant 0 : i32
    return %arg0, %1, %c0_i32 : i32, i32, i32
  }
  func.func @transform_2(%arg0: i32, %arg1: i32, %arg2: i32) -> (i32, i32, i32, i32, i32) {
    %c0_i32 = arith.constant 0 : i32
    %c0_i32_0 = arith.constant 0 : i32
    %c0_i32_1 = arith.constant 0 : i32
    %c0_i32_2 = arith.constant 0 : i32
    return %arg0, %arg1, %c0_i32, %c0_i32_0, %c0_i32_1 : i32, i32, i32, i32, i32
  }
  func.func @transform_3(%arg0: i32, %arg1: i32, %arg2: i32) -> (i32, i32, i32, i32, i32) {
    %c0_i32 = arith.constant 0 : i32
    %c0_i32_0 = arith.constant 0 : i32
    %c0_i32_1 = arith.constant 0 : i32
    %c0_i32_2 = arith.constant 0 : i32
    return %arg0, %arg1, %c0_i32, %c0_i32_0, %c0_i32_1 : i32, i32, i32, i32, i32
  }
}

</mosaic_0001>

<bundles_post_ra>
// kernel: weighted_loss.1
= control target key start
LH: loop header
LB: loop body
LE: loop exit
PB: predicated region body
PF: predicated region fallthrough
CT: control target
= control target key end

     0   :  { %s644_s12 = smov 0   ;;  %s646_s13 = smov 0   ;;  %s696_s0 = inlined_call_operand.vmem [shape: f32[2,4,8,128], index: 0, kind: input, shape index: {}]   ;;  %s697_s1 = inlined_call_operand.vmem [shape: s32[2,8,128], index: 1, kind: input, shape index: {}]   ;;  %s698_s2 = inlined_call_operand.vmem [shape: f32[2,1,4,8,128], index: 2, kind: output, shape index: {0}]   ;;  %s699_s3 = inlined_call_operand.vmem [shape: f32[2,1,4,8,128], index: 3, kind: output, shape index: {1}]  }
   0x1   :  { %s648_s14 = smov 0  }
   0x2 LB: > { %s33_s15 = sadd.s32 1, %s617_s13  ;;  %p535_p0 = scmp.ge.s32.totalorder %s621_s14, 1  ;;  %s621_s14 = sphi %s648_s14, %s14_s14   ;;  %s617_s13 = sphi %s646_s13, %s701_s13   ;;  %s613_s12 = sphi %s644_s12, %s700_s12  }
   0x3   : > { %p35_p1 = scmp.ge.s32.totalorder %s33_s15, 2  ;;  %p190_p2 = scmp.lt.s32.totalorder %s621_s14, 3 }
   0x5   : > { %s703_s15 = smov (%p35_p1, %s33_s15), 0  ;;  %p191_p3 = pnand %p535_p0, %p190_p2 }
   0x6   : > { %p240_p4 = scmp.lt.s32.totalorder (!%p191_p3), %s613_s12, 1 }
   0x7   : > { %194 = sbr.rel (%p191_p3) target bundleno = 67 (0x43), region = 28 }
   0xc   : > { %s705_s12 = smov (!%p240_p4, %s613_s12), 1  ;;  %v623_v7 = vmov 0.0  }
   0xd   : > { %s662_s16 = sshll.u32 %s705_s12, 5  ;;  %s538_s17 = sshll.u32 %s705_s12, 3 }
   0xe   : > { %s247_s20 = scalar_lea.vmem %s696_s0, %s662_s16  ;;  %s256_s23 = scalar_lea.vmem %s697_s1, %s538_s17 }
   0xf   : > { %v288_v0 = vld [vmem:[%s247_s20] sm:$0xff]  ;;  %v289_v1 = vld [vmem:[%s247_s20 + $0x8] sm:$0xff]  ;;  %v290_v2 = vld [vmem:[%s247_s20 + $0x10] sm:$0xff]  ;;  %s275_s26 = scalar_lea.vmem %s699_s3, %s662_s16  ;;  %s266_s29 = scalar_lea.vmem %s698_s2, %s662_s16 }
  0x10   : > { %v291_v3 = vld [vmem:[%s247_s20 + $0x18] sm:$0xff]  ;;  %v292_v4 = vld [vmem:[%s256_s23] sm:$0xff]  ;;  %v293_v5 = vmax.f32 %v288_v0, %v289_v1 }
  0x11   : > { %v294_v6 = vmax.f32 %v290_v2, %v291_v3  ;;  %vm313_vm0 = vcmp.eq.s32.totalorder %v292_v4, 0  ;;  %vm326_vm1 = vcmp.eq.s32.totalorder %v292_v4, 1  ;;  %vm341_vm2 = vcmp.eq.s32.totalorder %v292_v4, 2 }
  0x12   : > { %v543_v8 = vsel %vm313_vm0, 1.0, %v623_v7  ;;  %v544_v9 = vsel %vm326_vm1, 1.0, %v623_v7  ;;  %v549_v10 = vsel %vm341_vm2, 1.0, %v623_v7  ;;  %vm356_vm3 = vcmp.eq.s32.totalorder %v292_v4, 3 }
  0x13   : > { %v295_v11 = vmax.f32 %v293_v5, %v294_v6  ;;  %v554_v12 = vsel %vm356_vm3, 1.0, %v623_v7  ;;  %325 = vst [vmem:[%s275_s26] sm:$0xff] %v543_v8  ;;  %548 = vst [vmem:[%s275_s26 + $0x8] sm:$0xff] %v544_v9 }
  0x14   : > { %553 = vst [vmem:[%s275_s26 + $0x10] sm:$0xff] %v549_v10  ;;  %558 = vst [vmem:[%s275_s26 + $0x18] sm:$0xff] %v554_v12 }
  0x15   : > { %v296_v13 = vsub.f32 %v288_v0, %v295_v11  ;;  %v297_v14 = vsub.f32 %v289_v1, %v295_v11  ;;  %v298_v15 = vsub.f32 %v290_v2, %v295_v11  ;;  %v299_v16 = vsub.f32 %v291_v3, %v295_v11 }
  0x17   : > { %v300_v17 = vmul.f32 1.442695, %v296_v13  ;;  %v302_v18 = vmul.f32 1.442695, %v297_v14  ;;  %v304_v19 = vmul.f32 1.442695, %v298_v15 }
  0x18   : > { %v306_v20 = vmul.f32 1.442695, %v299_v16 }
  0x19   : > { %589 = vpow2.f32 %v300_v17 }
  0x1a   : > { %591 = vpow2.f32 %v302_v18 }
  0x1b   : > { %593 = vpow2.f32 %v304_v19 }
  0x1c   : > { %595 = vpow2.f32 %v306_v20 }
  0x26   : > { %v590_v21 = vpop.eup %589 }
  0x27   : > { %v592_v22 = vpop.eup %591 }
  0x28   : > { %v594_v23 = vpop.eup %593  ;;  %v308_v24 = vadd.f32 %v592_v22, %v590_v21 }
  0x29   : > { %v596_v25 = vpop.eup %595 }
  0x2a   : > { %v309_v26 = vadd.f32 %v594_v23, %v308_v24 }
  0x2c   : > { %v310_v27 = vadd.f32 %v596_v25, %v309_v26 }
  0x2e   : > { %597 = vlog2.f32 %v310_v27 }
  0x3b   : > { %v598_v28 = vpop.eup %597 }
  0x3c   : > { %v312_v29 = vmul.f32 0.6931472, %v598_v28 }
  0x3e   : > { %v314_v30 = vsub.f32 %v296_v13, %v312_v29  ;;  %v327_v31 = vsub.f32 %v297_v14, %v312_v29  ;;  %v342_v32 = vsub.f32 %v298_v15, %v312_v29  ;;  %v357_v33 = vsub.f32 %v299_v16, %v312_v29 }
  0x40   : > { %v315_v34 = vsel %vm313_vm0, %v314_v30, 0.0  ;;  %v328_v35 = vsel %vm326_vm1, %v327_v31, 0.0  ;;  %v343_v36 = vsel %vm341_vm2, %v342_v32, 0.0  ;;  %v358_v37 = vsel %vm356_vm3, %v357_v33, 0.0 }
  0x41   : > { %321 = vst [vmem:[%s266_s29] sm:$0xff] %v315_v34  ;;  %546 = vst [vmem:[%s266_s29 + $0x8] sm:$0xff] %v328_v35 }
  0x42   : > { %551 = vst [vmem:[%s266_s29 + $0x10] sm:$0xff] %v343_v36  ;;  %556 = vst [vmem:[%s266_s29 + $0x18] sm:$0xff] %v358_v37 }
  0x43 PF: > { %s14_s14 = sadd.s32 1, %s621_s14   ;;  %s700_s12 = smov %s617_s13 }
  0x44   : > { %p11_p5 = scmp.ge.s32.totalorder %s14_s14, 4   ;;  %s701_s13 = smov %s703_s15 }
  0x46   :  { %13 = sbr.rel (!%p11_p5) target bundleno = 2 (0x2), region = 83 }

</bundles_post_ra>
